<compile_context>
chip_gen: v7x
topology: tpu7x:2x2x1
jax: 0.10.0
libtpu: 0.0.40
codegen_flags: <defaults>
</compile_context>

<pallas_src>
import functools
import math

import numpy as np

import jax
import jax.numpy as jnp
from jax import lax
from jax.experimental import pallas as pl
from jax.experimental.pallas import tpu as pltpu


# -----------------------------------------------------------------------------
# Tiled linear projection:  y = x @ w_t + b   (w_t pre-transposed to [K, N])
# -----------------------------------------------------------------------------

def _linear_kernel(x_ref, w_ref, b_ref, o_ref, *, compute_dtype):
    # Output block is resident across the k axis (its index_map ignores k), so we
    # accumulate straight into it: init with the bias on the first k step.
    @pl.when(pl.program_id(2) == 0)
    def _():
        o_ref[...] = jnp.broadcast_to(b_ref[...], o_ref.shape)

    x = x_ref[...].astype(compute_dtype)
    w = w_ref[...].astype(compute_dtype)
    o_ref[...] += jnp.dot(x, w, preferred_element_type=jnp.float32)


def _pick_tile(dim, candidates=(512, 256, 128)):
    for c in candidates:
        if dim % c == 0:
            return c
    return dim  # full extent is always a legal block


def linear(x, w_t, b, compute_dtype):
    """y = x @ w_t + b.  x [M, K], w_t [K, N] (pre-transposed), b [1, N] -> [M, N] f32."""
    m, kdim = x.shape
    n = w_t.shape[1]
    tm, tn, tk = _pick_tile(m), _pick_tile(n), _pick_tile(kdim)
    grid = (m // tm, n // tn, kdim // tk)
    kernel = functools.partial(_linear_kernel, compute_dtype=compute_dtype)
    return pl.pallas_call(
        kernel,
        out_shape=jax.ShapeDtypeStruct((m, n), jnp.float32),
        grid=grid,
        in_specs=[
            pl.BlockSpec((tm, tk), lambda i, j, k: (i, k)),
            pl.BlockSpec((tk, tn), lambda i, j, k: (k, j)),
            pl.BlockSpec((1, tn), lambda i, j, k: (0, j)),
        ],
        out_specs=pl.BlockSpec((tm, tn), lambda i, j, k: (i, j)),
        compiler_params=pltpu.CompilerParams(
            dimension_semantics=("parallel", "parallel", "arbitrary"),
            vmem_limit_bytes=32 * 1024 * 1024),
    )(x, w_t, b)


# -----------------------------------------------------------------------------
# Relative attention kernel.  Grid = (batch, head_block); each step handles
# `hb` heads of one batch element with lane-dense [lq, hb*d] blocks.
# -----------------------------------------------------------------------------

def _rel_attn_kernel(q_ref, k_ref, v_ref, r_ref, rw_ref, rr_ref, *out_refs,
                     hb, d, lq, lr, scale, with_cov, compute_dtype):
    o_ref = out_refs[0]
    cov_ref = out_refs[1] if with_cov else None
    jb = pl.program_id(1)

    # ---- relative-shift ("skew") machinery, hoisted out of the head loop -----
    # RelativeShift.forward == per-row circular right-roll of bd by
    # (row + 1 - lq) mod lr, with positions past the "diagonal" taken from the
    # next row and the single pad position set to 0.
    d0 = lr - lq
    row = lax.broadcasted_iota(jnp.int32, (lq, lr), 0)
    col = lax.broadcasted_iota(jnp.int32, (lq, lr), 1)
    use_same = col <= row + d0
    from_pad = col == row + d0 + 1
    shift0 = (1 - lq) % lr           # base roll amount for row 0
    last_row = row == lq - 1         # its amount hits exactly lr -> identity

    # Single dense loads of the full [lq, wd] / [lr, wd] blocks; slice in-register.
    q_all = q_ref[0]
    k_all = k_ref[0]
    v_all = v_ref[0]
    r_all = r_ref[0]

    outs = []
    for i in range(hb):  # hb kept small (wd = hb*d ~ 128); TODO(synk): fori_loop if raised
        sl = slice(i * d, (i + 1) * d)
        q = q_all[:, sl]             # [lq, d]
        k = k_all[:, sl]
        v = v_all[:, sl]
        r = r_all[:, sl]             # [lr, d]
        head = jb * hb + i
        rw = rw_ref[pl.ds(head, 1), :]   # [1, d]
        rr = rr_ref[pl.ds(head, 1), :]

        # fold 1/sqrt(d) into the [lq, d] operand; cast MXU operands (f32 accumulate)
        qw = ((q + rw) * scale).astype(compute_dtype)
        qr = ((q + rr) * scale).astype(compute_dtype)
        kc = k.astype(compute_dtype)
        rc = r.astype(compute_dtype)

        ac = lax.dot_general(qw, kc, (((1,), (1,)), ((), ())),
                             preferred_element_type=jnp.float32)    # [lq, lq]
        bd = lax.dot_general(qr, rc, (((1,), (1,)), ((), ())),
                             preferred_element_type=jnp.float32)    # [lq, lr]

        # per-row right-roll by shift0 + row: one strided XLU rotate
        same = pltpu.roll(bd, shift0, 1, stride=1, stride_axis=0)
        same = jnp.where(last_row, bd, same)     # amount == lr wraps to identity
        nxt = pltpu.roll(same, lq - 1, 0)        # row q -> row q+1 (sublane rotate)
        shifted = jnp.where(use_same, same,
                            jnp.where(from_pad, 0.0, nxt))
        if lr != lq:
            shifted = shifted[:, :lq]

        scores = ac + shifted                                        # [lq, lq]

        # softmax in float32 (matches F.softmax(..., dtype=float32))
        m = jnp.max(scores, axis=-1, keepdims=True)
        p = jnp.exp(scores - m)
        s = jnp.sum(p, axis=-1, keepdims=True)

        if with_cov:
            p = p * pl.reciprocal(s, approx=False)   # coverage needs normalized p
            cov_ref[0, i, :, :] = p
            ctx = jnp.dot(p.astype(compute_dtype), v.astype(compute_dtype),
                          preferred_element_type=jnp.float32)
        else:
            ctx = jnp.dot(p.astype(compute_dtype), v.astype(compute_dtype),
                          preferred_element_type=jnp.float32)
            ctx = ctx * pl.reciprocal(s, approx=True)  # fold denom after PV (EUP)
        outs.append(ctx)

    # single lane-dense [lq, hb*d] store
    o_ref[...] = outs[0] if hb == 1 else jnp.concatenate(outs, axis=1)


def rel_attention(in_lin, r, r_w_bias, r_r_bias, scale, return_coverage,
                  compute_dtype, block_width=128):
    """in_lin: [bsz, lq, 3e] with columns ordered [q(h,d) | k | v];  r: [bsz, lr, e].

    Returns ctx as seq-first [lq, bsz*e] (== [lq, bsz, e] flattened) plus optional
    coverage [bsz, h, lq, lq]."""
    bsz, lq, three_e = in_lin.shape
    e = three_e // 3
    lr = r.shape[1]
    h, d = r_w_bias.shape

    # heads per grid step: lane-dense block width >= 128.
    # (on v6e, block_width of 256-512 amortizes per-step overhead further.)
    hb = max(1, block_width // d)
    hb = min(hb, h)
    while h % hb:
        hb -= 1
    nhb = h // hb
    wd = hb * d

    kernel = functools.partial(_rel_attn_kernel, hb=hb, d=d, lq=lq, lr=lr,
                               scale=scale, with_cov=return_coverage,
                               compute_dtype=compute_dtype)

    q_spec = pl.BlockSpec((1, lq, wd), lambda b, j: (b, 0, j))
    k_spec = pl.BlockSpec((1, lq, wd), lambda b, j: (b, 0, nhb + j))
    v_spec = pl.BlockSpec((1, lq, wd), lambda b, j: (b, 0, 2 * nhb + j))
    r_spec = pl.BlockSpec((1, lr, wd), lambda b, j: (b, 0, j))
    bias_spec = pl.BlockSpec((h, d), lambda b, j: (0, 0))

    # ctx written directly in seq-first layout: column block = b*nhb + j
    ctx_spec = pl.BlockSpec((lq, wd), lambda b, j: (0, b * nhb + j))

    if return_coverage:
        out_shape = (jax.ShapeDtypeStruct((lq, bsz * e), jnp.float32),
                     jax.ShapeDtypeStruct((bsz, h, lq, lq), jnp.float32))
        out_specs = (ctx_spec,
                     pl.BlockSpec((1, hb, lq, lq), lambda b, j: (b, j, 0, 0)))
    else:
        out_shape = jax.ShapeDtypeStruct((lq, bsz * e), jnp.float32)
        out_specs = ctx_spec

    res = pl.pallas_call(
        kernel,
        out_shape=out_shape,
        grid=(bsz, nhb),
        in_specs=[q_spec, k_spec, v_spec, r_spec, bias_spec, bias_spec],
        out_specs=out_specs,
        compiler_params=pltpu.CompilerParams(
            dimension_semantics=("parallel", "parallel"),
            vmem_limit_bytes=32 * 1024 * 1024),
    )(in_lin, in_lin, in_lin, r, r_w_bias, r_r_bias)

    if return_coverage:
        return res[0], res[1]
    return res, None


# -----------------------------------------------------------------------------
# One-time parameter preparation (pure re-layout of the PyTorch parameters):
#  * in_proj output dim reordered from interleaved (h, 3, d) to (3, h, d) so that
#    q / k / v are contiguous e-wide column slabs,
#  * all projection weights transposed to [K, N] for the natural MXU form.
# -----------------------------------------------------------------------------

def prepare_params(params, num_heads):
    e = params["out_proj_weight"].shape[0]
    h = num_heads
    d = e // h
    w_in = params["in_proj_weight"].reshape(h, 3, d, e).transpose(1, 0, 2, 3).reshape(3 * e, e)
    b_in = params["in_proj_bias"].reshape(h, 3, d).transpose(1, 0, 2).reshape(1, 3 * e)
    return {
        "w_in_t": w_in.T,                                   # [e, 3e]: [q | k | v]
        "b_in": b_in,
        "w_pos_t": params["pos_proj_weight"].T,             # [e, e]
        "b_pos": params["pos_proj_bias"].reshape(1, e),
        "w_out_t": params["out_proj_weight"].T,             # [e, e]
        "b_out": params["out_proj_bias"].reshape(1, e),
        "r_w_bias": params["r_w_bias"],
        "r_r_bias": params["r_r_bias"],
    }


# -----------------------------------------------------------------------------
# Full forward (Pallas-backed).  compute_dtype=bfloat16 -> bf16 MXU operands with
# f32 accumulation; float32 -> exact path used for strict validation.
# -----------------------------------------------------------------------------

def relative_self_attn_forward(x, pos, prepared, num_heads, return_coverage=False,
                               compute_dtype=jnp.bfloat16):
    lq, bsz, e = x.shape
    lr = pos.shape[0]
    h = num_heads
    d = e // h
    assert lr >= lq, "len_r must be >= len_q"
    scale = float(d) ** -0.5

    # The only remaining wrapper-side layout ops: batch-major views of the inputs.
    xb = jnp.transpose(x, (1, 0, 2)).reshape(bsz * lq, e)
    posb = jnp.transpose(pos, (1, 0, 2)).reshape(bsz * lr, e)

    in_lin = linear(xb, prepared["w_in_t"], prepared["b_in"], compute_dtype)
    in_lin = in_lin.reshape(bsz, lq, 3 * e)        # free reshape (row-major)
    r = linear(posb, prepared["w_pos_t"], prepared["b_pos"], compute_dtype)
    r = r.reshape(bsz, lr, e)

    ctx, cov = rel_attention(in_lin, r, prepared["r_w_bias"], prepared["r_r_bias"],
                             scale, return_coverage, compute_dtype)

    # ctx is already seq-first [lq, bsz*e]; out_proj input / final output are free reshapes.
    out = linear(ctx.reshape(lq * bsz, e), prepared["w_out_t"], prepared["b_out"],
                 compute_dtype).reshape(lq, bsz, e)

    coverage = cov.reshape(bsz * h, lq, lq) if cov is not None else None
    return out, coverage


# -----------------------------------------------------------------------------
# Pure-JAX reference (mirrors the PyTorch relative_self_attn_func forward)
# -----------------------------------------------------------------------------

def reference_forward(x, pos, params, num_heads):
    hp = jax.lax.Precision.HIGHEST
    lq, bsz, e = x.shape
    lr = pos.shape[0]
    h = num_heads
    d = e // h
    bh = bsz * h
    scale = float(d) ** -0.5

    in_lin = (jnp.dot(x.reshape(lq * bsz, e), params["in_proj_weight"].T, precision=hp)
              + params["in_proj_bias"])
    in_lin = in_lin.reshape(lq, bsz, h, 3, d)
    q = in_lin[..., 0, :].reshape(lq, bh, d)
    k = in_lin[..., 1, :].reshape(lq, bh, d)
    v = in_lin[..., 2, :].reshape(lq, bh, d)

    pos_lin = (jnp.dot(pos.reshape(lr * bsz, e), params["pos_proj_weight"].T, precision=hp)
               + params["pos_proj_bias"])
    r = pos_lin.reshape(lr, bh, d)

    rw_q = (q.reshape(lq, bsz, h, d) + params["r_w_bias"]).reshape(lq, bh, d)
    rr_q = (q.reshape(lq, bsz, h, d) + params["r_r_bias"]).reshape(lq, bh, d)

    ac = jnp.einsum("qnd,knd->nqk", rw_q, k, precision=hp) * scale
    bd = jnp.einsum("qnd,rnd->nqr", rr_q, r, precision=hp) * scale

    # RelativeShift.forward(x, batch_first=True, emb_last=False)
    pad = jnp.zeros((bh, lq, 1), bd.dtype)
    padded = jnp.concatenate([pad, bd], axis=2)                      # [bh, lq, lr+1]
    shifted = padded.reshape(bh, lq * (lr + 1))[:, lq:].reshape(bh, lq, lr)
    shifted = shifted[:, :, :lq]

    scores = ac + shifted
    p = jax.nn.softmax(scores, axis=-1)
    ctx = jnp.einsum("nqk,knd->qnd", p, v, precision=hp).reshape(lq, bsz, e)
    out = (jnp.dot(ctx.reshape(lq * bsz, e), params["out_proj_weight"].T, precision=hp)
           + params["out_proj_bias"])
    return out.reshape(lq, bsz, e), p


# -----------------------------------------------------------------------------
# Deterministic parameter init (matches reset_parameters(init='normal'))
# -----------------------------------------------------------------------------

def init_params(key, embed_dim, num_heads):
    d = embed_dim // num_heads
    std = math.sqrt(2.0 / (embed_dim + embed_dim))
    ks = jax.random.split(key, 5)
    return {
        "in_proj_weight": std * jax.random.normal(ks[0], (3 * embed_dim, embed_dim), jnp.float32),
        "out_proj_weight": std * jax.random.normal(ks[1], (embed_dim, embed_dim), jnp.float32),
        "pos_proj_weight": std * jax.random.normal(ks[2], (embed_dim, embed_dim), jnp.float32),
        "in_proj_bias": jnp.zeros((3 * embed_dim,), jnp.float32),
        "out_proj_bias": jnp.zeros((embed_dim,), jnp.float32),
        "pos_proj_bias": jnp.zeros((embed_dim,), jnp.float32),
        "r_w_bias": 0.02 * jax.random.normal(ks[3], (num_heads, d), jnp.float32),
        "r_r_bias": 0.02 * jax.random.normal(ks[4], (num_heads, d), jnp.float32),
    }


if __name__ == "__main__":
    embed_dim = 256
    num_heads = 4          # head_dim = 64, two heads per attention grid step
    len_q = 128
    len_r = 128            # relative-position length (>= len_q)
    bsz = 2

    root = jax.random.PRNGKey(0)
    kp, kx, kpos = jax.random.split(root, 3)
    params = init_params(kp, embed_dim, num_heads)
    prepared = prepare_params(params, num_heads)   # one-time weight re-layout

    x = jax.random.normal(kx, (len_q, bsz, embed_dim), jnp.float32)
    pos = jax.random.normal(kpos, (len_r, bsz, embed_dim), jnp.float32)

    out_ref, cov_ref = reference_forward(x, pos, params, num_heads)

    # Strict f32 validation (also exercises the optional coverage output path).
    out32, cov32 = relative_self_attn_forward(x, pos, prepared, num_heads,
                                              return_coverage=True,
                                              compute_dtype=jnp.float32)
    out32 = jax.block_until_ready(out32)
    cov32 = jax.block_until_ready(cov32)
    np.testing.assert_allclose(np.asarray(out32), np.asarray(out_ref), rtol=2e-3, atol=2e-3)
    np.testing.assert_allclose(np.asarray(cov32), np.asarray(cov_ref), rtol=2e-3, atol=2e-3)

    # Default fast path: bf16 MXU operands (f32 accumulation), no coverage writeback,
    # softmax normalization folded after the PV matmul with an approx reciprocal.
    out_bf16, _ = relative_self_attn_forward(x, pos, prepared, num_heads)
    out_bf16 = jax.block_until_ready(out_bf16)
    np.testing.assert_allclose(np.asarray(out_bf16), np.asarray(out_ref), rtol=1e-2, atol=1e-2)

    print("KERNEL_OK")
</pallas_src>

<mosaic_0001>
module attributes {stable_mosaic.version = 11 : i64} {
  func.func @_linear_kernel(%arg0: i32, %arg1: i32, %arg2: i32, %arg3: memref<256x256xf32, #tpu.memory_space<vmem>>, %arg4: memref<256x256xf32, #tpu.memory_space<vmem>>, %arg5: memref<1x256xf32, #tpu.memory_space<vmem>>, %arg6: memref<256x256xf32, #tpu.memory_space<vmem>>) attributes {dimension_semantics = [#tpu.dimension_semantics<parallel>, #tpu.dimension_semantics<parallel>, #tpu.dimension_semantics<arbitrary>], iteration_bounds = array<i64: 1, 3, 1>, scalar_prefetch = 0 : i64, scratch_operands = 0 : i64, tpu.core_type = #tpu.core_type<tc>, window_params = [{transform_indices = @transform_0, window_bounds = array<i64: 256, 256>}, {transform_indices = @transform_1, window_bounds = array<i64: 256, 256>}, {transform_indices = @transform_2, window_bounds = array<i64: 1, 256>}, {transform_indices = @transform_3, window_bounds = array<i64: 256, 256>}]} {
    %c0_i32 = arith.constant 0 : i32
    %0 = arith.cmpi eq, %arg2, %c0_i32 : i32
    %1 = arith.extui %0 : i1 to i32
    %c0_i32_0 = arith.constant 0 : i32
    %2 = arith.cmpi ne, %1, %c0_i32_0 : i32
    scf.if %2 {
      %c0_8 = arith.constant 0 : index
      %c0_9 = arith.constant 0 : index
      %9 = vector.load %arg5[%c0_8, %c0_9] : memref<1x256xf32, #tpu.memory_space<vmem>>, vector<1x256xf32>
      %10 = vector.shape_cast %9 : vector<1x256xf32> to vector<1x256xf32>
      %11 = vector.broadcast %10 : vector<1x256xf32> to vector<256x256xf32>
      %c0_10 = arith.constant 0 : index
      %c0_11 = arith.constant 0 : index
      %12 = vector.load %arg6[%c0_10, %c0_11] : memref<256x256xf32, #tpu.memory_space<vmem>>, vector<256x256xf32>
      tpu.vector_store %arg6[%c0_10, %c0_11], %11 {strides = array<i32>} : memref<256x256xf32, #tpu.memory_space<vmem>>, vector<256x256xf32>,
    } else {
    }
    %c0 = arith.constant 0 : index
    %c0_1 = arith.constant 0 : index
    %3 = vector.load %arg3[%c0, %c0_1] : memref<256x256xf32, #tpu.memory_space<vmem>>, vector<256x256xf32>
    %c0_2 = arith.constant 0 : index
    %c0_3 = arith.constant 0 : index
    %4 = vector.load %arg4[%c0_2, %c0_3] : memref<256x256xf32, #tpu.memory_space<vmem>>, vector<256x256xf32>
    %c0_4 = arith.constant 0 : index
    %c0_5 = arith.constant 0 : index
    %5 = vector.load %arg6[%c0_4, %c0_5] : memref<256x256xf32, #tpu.memory_space<vmem>>, vector<256x256xf32>
    %cst = arith.constant dense<0.000000e+00> : vector<256x256xf32>
    %6 = tpu.matmul %3, %4, %cst {dimension_numbers = #tpu.dot_dimension_numbers<[1], [0], [0], [1], [0, 0, 1, 1], [], []>} : vector<256x256xf32>, vector<256x256xf32>, vector<256x256xf32> -> vector<256x256xf32>
    %7 = arith.addf %5, %6 : vector<256x256xf32>
    %c0_6 = arith.constant 0 : index
    %c0_7 = arith.constant 0 : index
    %8 = vector.load %arg6[%c0_6, %c0_7] : memref<256x256xf32, #tpu.memory_space<vmem>>, vector<256x256xf32>
    tpu.vector_store %arg6[%c0_6, %c0_7], %7 {strides = array<i32>} : memref<256x256xf32, #tpu.memory_space<vmem>>, vector<256x256xf32>,
    return
  }
  func.func @transform_0(%arg0: i32, %arg1: i32, %arg2: i32) -> (i32, i32) {
    %c0_i32 = arith.constant 0 : i32
    return %arg0, %arg2 : i32, i32
  }
  func.func @transform_1(%arg0: i32, %arg1: i32, %arg2: i32) -> (i32, i32) {
    %c0_i32 = arith.constant 0 : i32
    return %arg2, %arg1 : i32, i32
  }
  func.func @transform_2(%arg0: i32, %arg1: i32, %arg2: i32) -> (i32, i32) {
    %c0_i32 = arith.constant 0 : i32
    %c0_i32_0 = arith.constant 0 : i32
    return %c0_i32, %arg1 : i32, i32
  }
  func.func @transform_3(%arg0: i32, %arg1: i32, %arg2: i32) -> (i32, i32) {
    %c0_i32 = arith.constant 0 : i32
    return %arg0, %arg1 : i32, i32
  }
}

</mosaic_0001>

<bundles_post_ra>
// kernel: tpu_custom_call.1
= control target key start
LH: loop header
LB: loop body
LE: loop exit
PB: predicated region body
PF: predicated region fallthrough
CT: control target
= control target key end

     0   :  { %8 = vsyncpa [#allocation3], 0  ;;  %s1853_s0 = inlined_call_operand.hbm [shape: f32[256,256], index: 0, kind: input, shape index: {}]   ;;  %s1854_s1 = inlined_call_operand.hbm [shape: f32[256,768], index: 1, kind: input, shape index: {}]   ;;  %s1855_s2 = inlined_call_operand.vmem [shape: f32[1,768], index: 2, kind: input, shape index: {}]   ;;  %s1856_s3 = inlined_call_operand.hbm [shape: f32[256,768], index: 3, kind: output, shape index: {}]  }
   0x1   :  { %9 = vsyncpa [#allocation6], 0 }
   0x2   :  { %11 = vsyncpa [#allocation6 + $0x1], 0 }
   0x3   :  { %12 = vsyncpa [#allocation4], 0 }
   0x4   :  { %14 = vsyncpa [#allocation4 + $0x1], 0  ;;  %s1428_s12 = smov 0   ;;  %s1430_s13 = smov 0  }
   0x5   :  { %s1432_s14 = smov 0   ;;  %s1434_s15 = smov 0  }
   0x6   :  { %s1436_s16 = smov 0   ;;  %s1438_s17 = smov 0  }
   0x7 LB: > { %s1058_s18 = sadd.s32 4294967295, %s1397_s17   ;;  %s1059_s19 = sadd.s32 4294967294, %s1397_s17   ;;  %s1397_s17 = sphi %s1438_s17, %s20_s17   ;;  %s1393_s16 = sphi %s1436_s16, %s1883_s16   ;;  %s1389_s15 = sphi %s1434_s15, %s1882_s15   ;;  %s1385_s14 = sphi %s1432_s14, %s1881_s14   ;;  %s1381_s13 = sphi %s1430_s13, %s1880_s13   ;;  %s1377_s12 = sphi %s1428_s12, %s1879_s12  }
   0x8   : > { %p83_p0 = scmp.ne.s32.totalorder %s1385_s14, %s1381_s13  ;;  %p84_p1 = scmp.eq.s32.totalorder %s1397_s17, 0 }
   0x9   : > { %p89_p2 = scmp.ne.s32.totalorder %s1381_s13, %s1377_s12  ;;  %p1465_p3 = scmp.eq.s32.totalorder %s1058_s18, 0 }
   0xa   : > { %p1469_p4 = por %p84_p1, %p83_p0  ;;  %p141_p5 = scmp.eq.s32.totalorder %s1058_s18, 2 }
   0xb   : > { %s1864_s20 = scalar_select %p1465_p3, 1, 0 }
   0xc   : > { %p1475_p6 = por %p1465_p3, %p89_p2  ;;  %p147_p7 = scmp.eq.s32.totalorder %s1059_s19, 2 }
   0xd   : > { %p1479_p8 = por %p141_p5, %p83_p0  ;;  %p1060_p9 = scmp.ge.s32.totalorder %s1397_s17, 1 }
   0xe   : > { %s1866_s22 = scalar_select %p1475_p6, 1, 0 }
   0xf   : > { %s1867_s23 = scalar_select %p1479_p8, 1, 0 }
  0x10   : > { %p1484_p10 = por %p147_p7, %p89_p2  ;;  %p154_p11 = scmp.lt.s32.totalorder %s1397_s17, 4 }
  0x11   : > { %s1399_s26 = smov [#allocation2]   ;;  %p1195_p0 = scmp.lt.s32.totalorder %s1397_s17, 3 }
  0x12   : > { %s1868_s24 = scalar_select %p1484_p10, 1, 0 }
  0x13   : > { %p1489_p12 = pnand %p1060_p9, %p154_p11  ;;  %s172_s27 = sshll.u32 %s1399_s26, 4  ;;  %s173_s27 = int_to_ptr.vmem [resolvable:$true] %s172_s27 }
  0x14   : > { %p1504_p2 = pnand %p1195_p0, %p1469_p4  ;;  %s35_s30 = sadd.s32 1, %s1393_s16 }
  0x15   : > { %s1869_s25 = scalar_select %p1489_p12, 1, 0 }
  0x16   : > { %p1182_p13 = pneg %p1489_p12  ;;  %s1253_s6 = scalar_lea.hbm %s1853_s0, 8192 }
  0x17   : > { %s1871_s29 = scalar_select %p1504_p2, 1, 0 }
  0x18   : > { %p1498_p1 = pnand %p1182_p13, %p1465_p3  ;;  %p1254_p5 = scmp.ne.s32.totalorder %s1853_s0, %s1253_s6 }
  0x19   : > { %p1260_p4 = scmp.lt.u32.totalorder %s1253_s6, %s1853_s0 }
  0x1a   : > { %p1255_p7 = pneg %p1498_p1 }
  0x1c   : > { %p1256_p9 = pnand %p1255_p7, %p1254_p5 }
  0x1e   : > { %p1257_p11 = pneg %p1256_p9 }
  0x20   : > { %p1262_p13 = pnand %p1260_p4, %p1257_p11 }
  0x22   : > { %1265 = shalt.err (!%p1262_p13)
}
  0x23   : > { %s1266_s11 = scalar_lea.vmem %s173_s27, 8192  ;;  %p1274_p6 = scmp.lt.s32.totalorder %s173_s27, %s173_s27 }
  0x24   : > { %p1267_p0 = scmp.ne.s32.totalorder %s173_s27, %s1266_s11  ;;  %p1275_p3 = scmp.lt.s32.totalorder %s1266_s11, %s1266_s11 }
  0x26   : > { %p1269_p10 = pnand %p1267_p0, %p1255_p7  ;;  %p1276_p12 = por %p1275_p3, %p1274_p6 }
  0x28   : > { %p1270_p8 = pneg %p1269_p10 }
  0x2a   : > { %p1277_p2 = pnand %p1276_p12, %p1270_p8 }
  0x2c   : > { %1280 = shalt.err (!%p1277_p2)
}
  0x2d   : > { %s1863_s18 = smov 256   ;;  %s1401_s19 = smov 16  }
  0x2e   : > { %1185 = dma.hbm_to_vmem [thread:$0]  (!%p1498_p1), %s1853_s0, 8192, %s173_s27, [#allocation3], %s1863_s18, %s1863_s18, %s1401_s19  }
  0x2f   : > { %p37_p10 = scmp.ge.s32.totalorder %s35_s30, 3  ;;  %s76_s4 = sadd.s32 1, %s1385_s14 }
  0x30   : > { %s186_s5 = sand.u32 1, %s1385_s14   ;;  %s1076_s8 = sshll.u32 %s1393_s16, 8 }
  0x31   : > { %s1885_s30 = smov (%p37_p10, %s35_s30), 0  ;;  %s1063_s6 = sshll.u32 %s186_s5, 9 }
  0x32   : > { %s72_s7 = ssub.s32 %s1393_s16, %s1885_s30  ;;  %s1538_s10 = scalar_lea.hbm %s1854_s1, %s1076_s8 }
  0x33   : > { %p74_p3 = scmp.eq.s32.totalorder %s72_s7, 0  ;;  %s190_s27 = scalar_lea.vmem [#allocation5], %s1063_s6 }
  0x34   : > { %s200_s11 = sshll.u32 %s190_s27, 4  ;;  %s1545_s26 = scalar_lea.sflag [#allocation6], %s186_s5  ;;  %s1543_s11 = int_to_ptr.vmem [resolvable:$true] %s200_s11 }
  0x35   : > { %s1541_s21 = scalar_select %p74_p3, %s1385_s14, %s76_s4  }
  0x36   : > { %s1281_s18 = scalar_lea.hbm %s1538_s10, 8192  ;;  %p1872_p8 = scmp.ne.s32.totalorder %s1871_s29, 0 }
  0x37   : > { %p1282_p6 = scmp.ne.s32.totalorder %s1538_s10, %s1281_s18  ;;  %s1286_s28 = scalar_lea.hbm %s1854_s1, 24576 }
  0x38   : > { %p1283_p12 = pneg %p1872_p8  ;;  %p1287_p5 = scmp.lt.u32.totalorder %s1538_s10, %s1854_s1 }
  0x39   : > { %p1288_p7 = scmp.lt.u32.totalorder %s1286_s28, %s1281_s18  ;;  %p1290_p11 = scmp.lt.u32.totalorder %s1281_s18, %s1538_s10 }
  0x3a   : > { %p1284_p1 = pnand %p1283_p12, %p1282_p6 }
  0x3b   : > { %p1289_p9 = por %p1288_p7, %p1287_p5 }
  0x3c   : > { %p1285_p2 = pneg %p1284_p1 }
  0x3d   : > { %p1291_p4 = por %p1290_p11, %p1289_p9 }
  0x3f   : > { %p1292_p13 = pnand %p1291_p4, %p1285_p2 }
  0x41   : > { %1295 = shalt.err (!%p1292_p13)
}
  0x42   : > { %s1296_s4 = scalar_lea.vmem %s1543_s11, 8192  ;;  %s1402_s5 = smov [#allocation5]  }
  0x43   : > { %p1297_p0 = scmp.ne.s32.totalorder %s1543_s11, %s1296_s4  ;;  %s1301_s27 = sshll.u32 %s1402_s5, 4  ;;  %s1302_s27 = int_to_ptr.vmem [resolvable:$false] %s1301_s27 }
  0x44   : > { %s1303_s7 = scalar_lea.vmem %s1302_s27, 16384  ;;  %p1304_p6 = scmp.lt.s32.totalorder %s1543_s11, %s1302_s27 }
  0x45   : > { %p1299_p10 = pnand %p1297_p0, %p1283_p12  ;;  %p1305_p1 = scmp.lt.s32.totalorder %s1303_s7, %s1296_s4 }
  0x47   : > { %p1300_p3 = pneg %p1299_p10  ;;  %p1306_p5 = por %p1305_p1, %p1304_p6 }
  0x49   : > { %p1307_p7 = pnand %p1306_p5, %p1300_p3 }
  0x4b   : > { %1310 = shalt.err (!%p1307_p7)
}
  0x4c   : > { %s1403_s18 = smov 768   ;;  %s1873_s8 = smov 256  }
  0x4d   : > { %1189 = dma.hbm_to_vmem [thread:$0]  (!%p1872_p8), %s1538_s10, 8192, %s1543_s11, %s1545_s26, %s1403_s18, %s1873_s8, %s1401_s19  }
  0x4e   : > { %p1874_p12 = scmp.ne.s32.totalorder %s1869_s25, 0 }
  0x4f   : > { %p1875_p2 = scmp.ne.s32.totalorder (!%p1874_p12), %s1864_s20, 0 }
  0x50   : > { %220 = sbr.rel (%p1874_p12) target bundleno = 450 (0x1c2), region = 32 }
  0x57   : > { %1364 = dma.done.wait (%p1875_p2), [#allocation3], 8192  }
  0x58   : > { %1366 = vsyncadd (%p1875_p2), [#allocation3], 4294959104  ;;  %s1582_s28 = sand.u32 1, %s1381_s13   ;;  %p1876_p8 = scmp.ne.s32.totalorder %s1866_s22, 0 }
  0x59   : > { %s1068_s29 = sshll.u32 %s1582_s28, 9  ;;  %s227_s6 = scalar_lea.sflag [#allocation6], %s1582_s28 }
  0x5a   : > { %s1588_s19 = scalar_lea.vmem [#allocation5], %s1068_s29 }
  0x5b   : > { %1368 = dma.done.wait (%p1876_p8), %s227_s6, 8192  }
  0x5c   : > { %1370 = vsyncadd (%p1876_p8), %s227_s6, 4294959104  ;;  %v413_v0 = vld [vmem:[%s1588_s19 + $0x8] sm:$0xff]  ;;  %v415_v1 = vld [vmem:[%s1588_s19 + $0x18] sm:$0xff]  ;;  %s1070_s20 = sshll.u32 %s1389_s15, 1  ;;  %s1672_s11 = scalar_lea.vmem [#allocation7], %s1068_s29 }
  0x5d   : > { %v412_v2 = vld [vmem:[%s1588_s19] sm:$0xff]  ;;  %v1078_v3 = vpack.c.bf16 %v415_v1, %v413_v0  ;;  %v414_v4 = vld [vmem:[%s1588_s19 + $0x10] sm:$0xff]  ;;  %v417_v5 = vld [vmem:[%s1588_s19 + $0x28] sm:$0xff]  ;;  %p262_p9 = scmp.lt.s32.totalorder %s1070_s20, 5  ;;  %s1077_s26 = sshll.u32 %s1389_s15, 8 }
  0x5e   : > { %v419_v6 = vld [vmem:[%s1588_s19 + $0x38] sm:$0xff]  ;;  %v1080_v7 = vpack.c.bf16 %v414_v4, %v412_v2  ;;  %v416_v9 = vld [vmem:[%s1588_s19 + $0x20] sm:$0xff]  ;;  %v418_v10 = vld [vmem:[%s1588_s19 + $0x30] sm:$0xff]  ;;  %s942_s9 = sshll.u32 %s1672_s11, 4  ;;  %s1795_s15 = scalar_lea.hbm %s1856_s3, %s1077_s26  ;;  %s1799_s9 = int_to_ptr.vmem [resolvable:$true] %s942_s9 }
  0x5f   : > { %v1082_v8 = vpack.c.bf16 %v419_v6, %v417_v5  ;;  %v421_v11 = vld [vmem:[%s1588_s19 + $0x48] sm:$0xff]  ;;  %1079 = vmatprep.subr.bf16.mxu0 %v1078_v3  ;;  %1142 = vmatprep.subr.bf16.mxu1 %v1078_v3  ;;  %v423_v12 = vld [vmem:[%s1588_s19 + $0x58] sm:$0xff]  ;;  %v1084_v13 = vpack.c.bf16 %v418_v10, %v416_v9  ;;  %v420_v15 = vld [vmem:[%s1588_s19 + $0x40] sm:$0xff]  ;;  %s1887_s20 = smov (!%p262_p9, %s1070_s20), 5  ;;  %s926_s27 = scalar_lea.sflag [#allocation4], %s1582_s28 }
  0x60   : > { %1081 = vmatpush1.bf16.msra.mxu0 %v1080_v7  ;;  %1158 = vmatpush1.bf16.msra.mxu1 %v1080_v7  ;;  %v1086_v14 = vpack.c.bf16 %v423_v12, %v421_v11  ;;  %v422_v16 = vld [vmem:[%s1588_s19 + $0x50] sm:$0xff]  ;;  %v425_v17 = vld [vmem:[%s1588_s19 + $0x68] sm:$0xff]  ;;  %v427_v18 = vld [vmem:[%s1588_s19 + $0x78] sm:$0xff]  ;;  %s264_s10 = scalar_lea.vmem %s1855_s2, %s1887_s20  ;;  %s1311_s7 = scalar_lea.vmem %s1799_s9, 8192 }
  0x61   : > { %1083 = vmatprep.subr.bf16.mxu0 %v1082_v8  ;;  %1143 = vmatprep.subr.bf16.mxu1 %v1082_v8  ;;  %v1088_v19 = vpack.c.bf16 %v422_v16, %v420_v15  ;;  %v1090_v20 = vpack.c.bf16 %v427_v18, %v425_v17  ;;  %v424_v21 = vld [vmem:[%s1588_s19 + $0x60] sm:$0xff]  ;;  %v426_v22 = vld [vmem:[%s1588_s19 + $0x70] sm:$0xff]  ;;  %v429_v23 = vld [vmem:[%s1588_s19 + $0x88] sm:$0xff]  ;;  %p1312_p11 = scmp.ne.s32.totalorder %s1799_s9, %s1311_s7  ;;  %p1877_p4 = scmp.ne.s32.totalorder %s1867_s23, 0 }
  0x62   : > { %v431_v24 = vld [vmem:[%s1588_s19 + $0x98] sm:$0xff]  ;;  %v1092_v25 = vpack.c.bf16 %v426_v22, %v424_v21  ;;  %v428_v27 = vld [vmem:[%s1588_s19 + $0x80] sm:$0xff]  ;;  %v430_v28 = vld [vmem:[%s1588_s19 + $0x90] sm:$0xff]  ;;  %s1404_s18 = smov [#allocation7]  }
  0x63   : > { %v1094_v26 = vpack.c.bf16 %v431_v24, %v429_v23  ;;  %v433_v29 = vld [vmem:[%s1588_s19 + $0xa8] sm:$0xff]  ;;  %v435_v30 = vld [vmem:[%s1588_s19 + $0xb8] sm:$0xff]  ;;  %v1096_v31 = vpack.c.bf16 %v430_v28, %v428_v27  ;;  %v432_v33 = vld [vmem:[%s1588_s19 + $0xa0] sm:$0xff]  ;;  %p1313_p13 = pnand %p1312_p11, %p1877_p4  ;;  %s1315_s8 = sshll.u32 %s1404_s18, 4  ;;  %s1316_s8 = int_to_ptr.vmem [resolvable:$false] %s1315_s8 }
  0x64   : > { %1085 = vmatpush1.bf16.msra.mxu0 %v1084_v13  ;;  %1159 = vmatpush1.bf16.msra.mxu1 %v1084_v13  ;;  %v1098_v32 = vpack.c.bf16 %v435_v30, %v433_v29  ;;  %v434_v34 = vld [vmem:[%s1588_s19 + $0xb0] sm:$0xff]  ;;  %v437_v35 = vld [vmem:[%s1588_s19 + $0xc8] sm:$0xff]  ;;  %v439_v36 = vld [vmem:[%s1588_s19 + $0xd8] sm:$0xff]  ;;  %s1317_s29 = scalar_lea.vmem %s1316_s8, 16384  ;;  %p1318_p10 = scmp.lt.s32.totalorder %s1799_s9, %s1316_s8 }
  0x65   : > { %1087 = vmatprep.subr.bf16.mxu0 %v1086_v14  ;;  %1144 = vmatprep.subr.bf16.mxu1 %v1086_v14  ;;  %v1100_v37 = vpack.c.bf16 %v434_v34, %v432_v33  ;;  %v436_v38 = vld [vmem:[%s1588_s19 + $0xc0] sm:$0xff]  ;;  %v1102_v39 = vpack.c.bf16 %v439_v36, %v437_v35  ;;  %v438_v40 = vld [vmem:[%s1588_s19 + $0xd0] sm:$0xff]  ;;  %v349_v41 = vld [vmem:[#allocation2 + $0x8] sm:$0xff]  ;;  %p1314_p0 = pneg %p1313_p13  ;;  %p1319_p3 = scmp.lt.s32.totalorder %s1317_s29, %s1311_s7 }
  0x66   : > { %v381_v42 = vld [vmem:[#allocation2 + $0x108] sm:$0xff]  ;;  %v443_v44 = vld [vmem:[%s1588_s19 + $0xf8] sm:$0xff]  ;;  %604 = vmatprep.mubr.f32.mxu0 %v349_v41  ;;  %v1104_v45 = vpack.c.bf16 %v438_v40, %v436_v38  ;;  %v440_v47 = vld [vmem:[%s1588_s19 + $0xe0] sm:$0xff] }
  0x67   : > { %v441_v43 = vld [vmem:[%s1588_s19 + $0xe8] sm:$0xff]  ;;  %700 = vmatprep.mubr.f32.mxu1 %v381_v42  ;;  %v442_v48 = vld [vmem:[%s1588_s19 + $0xf0] sm:$0xff]  ;;  %v447_v50 = vld [vmem:[%s1588_s19 + $0x118] sm:$0xff]  ;;  %p1320_p6 = por %p1319_p3, %p1318_p10 }
  0x68   : > { %1089 = vmatpush1.bf16.msra.mxu0 %v1088_v19  ;;  %1160 = vmatpush1.bf16.msra.mxu1 %v1088_v19  ;;  %v1106_v46 = vpack.c.bf16 %v443_v44, %v441_v43  ;;  %v445_v49 = vld [vmem:[%s1588_s19 + $0x108] sm:$0xff]  ;;  %v1108_v51 = vpack.c.bf16 %v442_v48, %v440_v47  ;;  %v444_v53 = vld [vmem:[%s1588_s19 + $0x100] sm:$0xff]  ;;  %v446_v54 = vld [vmem:[%s1588_s19 + $0x110] sm:$0xff] }
  0x69   : > { %1091 = vmatprep.subr.bf16.mxu0 %v1090_v20  ;;  %1145 = vmatprep.subr.bf16.mxu1 %v1090_v20  ;;  %v1110_v52 = vpack.c.bf16 %v447_v50, %v445_v49  ;;  %v449_v55 = vld [vmem:[%s1588_s19 + $0x128] sm:$0xff]  ;;  %v451_v56 = vld [vmem:[%s1588_s19 + $0x138] sm:$0xff]  ;;  %v1112_v57 = vpack.c.bf16 %v446_v54, %v444_v53  ;;  %v448_v59 = vld [vmem:[%s1588_s19 + $0x120] sm:$0xff]  ;;  %p1321_p1 = pnand %p1320_p6, %p1314_p0 }
  0x6a   : > { %v1114_v58 = vpack.c.bf16 %v451_v56, %v449_v55  ;;  %v450_v60 = vld [vmem:[%s1588_s19 + $0x130] sm:$0xff]  ;;  %v453_v61 = vld [vmem:[%s1588_s19 + $0x148] sm:$0xff]  ;;  %v455_v62 = vld [vmem:[%s1588_s19 + $0x158] sm:$0xff] }
  0x6b   : > { %v1116_v63 = vpack.c.bf16 %v450_v60, %v448_v59  ;;  %v1118_v0 = vpack.c.bf16 %v455_v62, %v453_v61  ;;  %v452_v1 = vld [vmem:[%s1588_s19 + $0x140] sm:$0xff]  ;;  %v454_v2 = vld [vmem:[%s1588_s19 + $0x150] sm:$0xff]  ;;  %v457_v3 = vld [vmem:[%s1588_s19 + $0x168] sm:$0xff] }
  0x6c   : > { %1093 = vmatpush1.bf16.msra.mxu0 %v1092_v25  ;;  %1161 = vmatpush1.bf16.msra.mxu1 %v1092_v25  ;;  %v459_v4 = vld [vmem:[%s1588_s19 + $0x178] sm:$0xff]  ;;  %v1120_v5 = vpack.c.bf16 %v454_v2, %v452_v1  ;;  %v456_v7 = vld [vmem:[%s1588_s19 + $0x160] sm:$0xff]  ;;  %v458_v8 = vld [vmem:[%s1588_s19 + $0x170] sm:$0xff] }
  0x6d   : > { %1095 = vmatprep.subr.bf16.mxu0 %v1094_v26  ;;  %1146 = vmatprep.subr.bf16.mxu1 %v1094_v26  ;;  %v1122_v6 = vpack.c.bf16 %v459_v4, %v457_v3  ;;  %v461_v9 = vld [vmem:[%s1588_s19 + $0x188] sm:$0xff]  ;;  %v463_v10 = vld [vmem:[%s1588_s19 + $0x198] sm:$0xff]  ;;  %v1124_v11 = vpack.c.bf16 %v458_v8, %v456_v7  ;;  %v460_v13 = vld [vmem:[%s1588_s19 + $0x180] sm:$0xff] }
  0x6e   : > { %v1126_v12 = vpack.c.bf16 %v463_v10, %v461_v9  ;;  %v462_v14 = vld [vmem:[%s1588_s19 + $0x190] sm:$0xff]  ;;  %v465_v15 = vld [vmem:[%s1588_s19 + $0x1a8] sm:$0xff]  ;;  %v467_v16 = vld [vmem:[%s1588_s19 + $0x1b8] sm:$0xff] }
  0x6f   : > { %v1128_v17 = vpack.c.bf16 %v462_v14, %v460_v13  ;;  %v1130_v18 = vpack.c.bf16 %v467_v16, %v465_v15  ;;  %v464_v19 = vld [vmem:[%s1588_s19 + $0x1a0] sm:$0xff]  ;;  %v466_v20 = vld [vmem:[%s1588_s19 + $0x1b0] sm:$0xff]  ;;  %v469_v21 = vld [vmem:[%s1588_s19 + $0x1c8] sm:$0xff] }
  0x70   : > { %1097 = vmatpush1.bf16.msra.mxu0 %v1096_v31  ;;  %1162 = vmatpush1.bf16.msra.mxu1 %v1096_v31  ;;  %v471_v22 = vld [vmem:[%s1588_s19 + $0x1d8] sm:$0xff]  ;;  %v1132_v23 = vpack.c.bf16 %v466_v20, %v464_v19  ;;  %v468_v25 = vld [vmem:[%s1588_s19 + $0x1c0] sm:$0xff]  ;;  %v470_v26 = vld [vmem:[%s1588_s19 + $0x1d0] sm:$0xff] }
  0x71   : > { %1099 = vmatprep.subr.bf16.mxu0 %v1098_v32  ;;  %1147 = vmatprep.subr.bf16.mxu1 %v1098_v32  ;;  %v1134_v24 = vpack.c.bf16 %v471_v22, %v469_v21  ;;  %v473_v27 = vld [vmem:[%s1588_s19 + $0x1e8] sm:$0xff]  ;;  %v475_v28 = vld [vmem:[%s1588_s19 + $0x1f8] sm:$0xff]  ;;  %v1136_v29 = vpack.c.bf16 %v470_v26, %v468_v25  ;;  %v472_v31 = vld [vmem:[%s1588_s19 + $0x1e0] sm:$0xff] }
  0x72   : > { %v1138_v30 = vpack.c.bf16 %v475_v28, %v473_v27  ;;  %v474_v32 = vld [vmem:[%s1588_s19 + $0x1f0] sm:$0xff]  ;;  %v348_v34 = vld [vmem:[#allocation2] sm:$0xff]  ;;  %v351_v36 = vld [vmem:[#allocation2 + $0x18] sm:$0xff] }
  0x73   : > { %v1140_v33 = vpack.c.bf16 %v474_v32, %v472_v31  ;;  %v380_v35 = vld [vmem:[#allocation2 + $0x100] sm:$0xff]  ;;  %v350_v38 = vld [vmem:[#allocation2 + $0x10] sm:$0xff]  ;;  %v353_v40 = vld [vmem:[#allocation2 + $0x28] sm:$0xff]  ;;  %v274_v32 = vlaneseq }
  0x74   : > { %1101 = vmatpush1.bf16.msra.mxu0 %v1100_v37  ;;  %1163 = vmatpush1.bf16.msra.mxu1 %v1100_v37  ;;  %v383_v37 = vld [vmem:[#allocation2 + $0x118] sm:$0xff]  ;;  %v385_v41 = vld [vmem:[#allocation2 + $0x128] sm:$0xff]  ;;  %v352_v42 = vld [vmem:[#allocation2 + $0x20] sm:$0xff] }
  0x75   : > { %1103 = vmatprep.subr.bf16.mxu0 %v1102_v39  ;;  %1148 = vmatprep.subr.bf16.mxu1 %v1102_v39  ;;  %v382_v39 = vld [vmem:[#allocation2 + $0x110] sm:$0xff]  ;;  %v384_v43 = vld [vmem:[#allocation2 + $0x120] sm:$0xff]  ;;  %v355_v44 = vld [vmem:[#allocation2 + $0x38] sm:$0xff] }
  0x76   : > { %v386_v47 = vld [vmem:[#allocation2 + $0x130] sm:$0xff]  ;;  %v357_v48 = vld [vmem:[#allocation2 + $0x48] sm:$0xff]  ;;  %v356_v50 = vld [vmem:[#allocation2 + $0x40] sm:$0xff] }
  0x77   : > { %v389_v49 = vld [vmem:[#allocation2 + $0x148] sm:$0xff]  ;;  %v391_v53 = vld [vmem:[#allocation2 + $0x158] sm:$0xff]  ;;  %v358_v54 = vld [vmem:[#allocation2 + $0x50] sm:$0xff] }
  0x78   : > { %1105 = vmatpush1.bf16.msra.mxu0 %v1104_v45  ;;  %1164 = vmatpush1.bf16.msra.mxu1 %v1104_v45  ;;  %v387_v45 = vld [vmem:[#allocation2 + $0x138] sm:$0xff]  ;;  %v390_v55 = vld [vmem:[#allocation2 + $0x150] sm:$0xff]  ;;  %v361_v56 = vld [vmem:[#allocation2 + $0x68] sm:$0xff] }
  0x79   : > { %1107 = vmatprep.subr.bf16.mxu0 %v1106_v46  ;;  %1149 = vmatprep.subr.bf16.mxu1 %v1106_v46  ;;  %v354_v46 = vld [vmem:[#allocation2 + $0x30] sm:$0xff]  ;;  %v392_v59 = vld [vmem:[#allocation2 + $0x160] sm:$0xff]  ;;  %v363_v60 = vld [vmem:[#allocation2 + $0x78] sm:$0xff] }
  0x7a   : > { %v395_v61 = vld [vmem:[#allocation2 + $0x178] sm:$0xff]  ;;  %v362_v62 = vld [vmem:[#allocation2 + $0x70] sm:$0xff]  ;;  %v397_v1 = vld [vmem:[#allocation2 + $0x188] sm:$0xff] }
  0x7b   : > { %v364_v2 = vld [vmem:[#allocation2 + $0x80] sm:$0xff]  ;;  %v367_v4 = vld [vmem:[#allocation2 + $0x98] sm:$0xff]  ;;  %v398_v7 = vld [vmem:[#allocation2 + $0x190] sm:$0xff] }
  0x7c   : > { %1109 = vmatpush1.bf16.msra.mxu0 %v1108_v51  ;;  %1165 = vmatpush1.bf16.msra.mxu1 %v1108_v51  ;;  %v388_v51 = vld [vmem:[#allocation2 + $0x140] sm:$0xff]  ;;  %v369_v8 = vld [vmem:[#allocation2 + $0xa8] sm:$0xff]  ;;  %v403_v13 = vld [vmem:[#allocation2 + $0x1b8] sm:$0xff] }
  0x7d   : > { %1111 = vmatprep.subr.bf16.mxu0 %v1110_v52  ;;  %1150 = vmatprep.subr.bf16.mxu1 %v1110_v52  ;;  %v359_v52 = vld [vmem:[#allocation2 + $0x58] sm:$0xff]  ;;  %v396_v3 = vld [vmem:[#allocation2 + $0x180] sm:$0xff]  ;;  %v401_v9 = vld [vmem:[#allocation2 + $0x1a8] sm:$0xff] }
  0x7e   : > { %v368_v10 = vld [vmem:[#allocation2 + $0xa0] sm:$0xff]  ;;  %v370_v14 = vld [vmem:[#allocation2 + $0xb0] sm:$0xff]  ;;  %v373_v16 = vld [vmem:[#allocation2 + $0xc8] sm:$0xff] }
  0x7f   : > { %v402_v15 = vld [vmem:[#allocation2 + $0x1b0] sm:$0xff]  ;;  %v404_v19 = vld [vmem:[#allocation2 + $0x1c0] sm:$0xff]  ;;  %v375_v20 = vld [vmem:[#allocation2 + $0xd8] sm:$0xff] }
  0x80   : > { %1113 = vmatpush1.bf16.msra.mxu0 %v1112_v57  ;;  %1166 = vmatpush1.bf16.msra.mxu1 %v1112_v57  ;;  %v393_v57 = vld [vmem:[#allocation2 + $0x168] sm:$0xff]  ;;  %v407_v21 = vld [vmem:[#allocation2 + $0x1d8] sm:$0xff]  ;;  %v374_v22 = vld [vmem:[#allocation2 + $0xd0] sm:$0xff] }
  0x81   : > { %1115 = vmatprep.subr.bf16.mxu0 %v1114_v58  ;;  %1151 = vmatprep.subr.bf16.mxu1 %v1114_v58  ;;  %v360_v58 = vld [vmem:[#allocation2 + $0x60] sm:$0xff]  ;;  %v409_v25 = vld [vmem:[#allocation2 + $0x1e8] sm:$0xff]  ;;  %v379_v28 = vld [vmem:[#allocation2 + $0xf8] sm:$0xff] }
  0x82   : > { %v376_v26 = vld [vmem:[#allocation2 + $0xe0] sm:$0xff]  ;;  %v410_v31 = vld [vmem:[#allocation2 + $0x1f0] sm:$0xff] }
  0x83   : > { %v408_v27 = vld [vmem:[#allocation2 + $0x1e0] sm:$0xff] }
  0x84   : > { %1117 = vmatpush1.bf16.msra.mxu0 %v1116_v63  ;;  %1167 = vmatpush1.bf16.msra.mxu1 %v1116_v63  ;;  %v394_v63 = vld [vmem:[#allocation2 + $0x170] sm:$0xff] }
  0x85   : > { %1119 = vmatprep.subr.bf16.mxu0 %v1118_v0  ;;  %1152 = vmatprep.subr.bf16.mxu1 %v1118_v0  ;;  %v365_v0 = vld [vmem:[#allocation2 + $0x88] sm:$0xff] }
  0x88   : > { %1121 = vmatpush1.bf16.msra.mxu0 %v1120_v5  ;;  %1168 = vmatpush1.bf16.msra.mxu1 %v1120_v5  ;;  %v399_v5 = vld [vmem:[#allocation2 + $0x198] sm:$0xff] }
  0x89   : > { %1123 = vmatprep.subr.bf16.mxu0 %v1122_v6  ;;  %1153 = vmatprep.subr.bf16.mxu1 %v1122_v6  ;;  %v366_v6 = vld [vmem:[#allocation2 + $0x90] sm:$0xff] }
  0x8c   : > { %1125 = vmatpush1.bf16.msra.mxu0 %v1124_v11  ;;  %1169 = vmatpush1.bf16.msra.mxu1 %v1124_v11  ;;  %v400_v11 = vld [vmem:[#allocation2 + $0x1a0] sm:$0xff] }
  0x8d   : > { %1127 = vmatprep.subr.bf16.mxu0 %v1126_v12  ;;  %1154 = vmatprep.subr.bf16.mxu1 %v1126_v12  ;;  %v371_v12 = vld [vmem:[#allocation2 + $0xb8] sm:$0xff] }
  0x90   : > { %1129 = vmatpush1.bf16.msra.mxu0 %v1128_v17  ;;  %1170 = vmatpush1.bf16.msra.mxu1 %v1128_v17  ;;  %v405_v17 = vld [vmem:[#allocation2 + $0x1c8] sm:$0xff] }
  0x91   : > { %1131 = vmatprep.subr.bf16.mxu0 %v1130_v18  ;;  %1155 = vmatprep.subr.bf16.mxu1 %v1130_v18  ;;  %v372_v18 = vld [vmem:[#allocation2 + $0xc0] sm:$0xff] }
  0x94   : > { %1133 = vmatpush1.bf16.msra.mxu0 %v1132_v23  ;;  %1171 = vmatpush1.bf16.msra.mxu1 %v1132_v23  ;;  %v406_v23 = vld [vmem:[#allocation2 + $0x1d0] sm:$0xff] }
  0x95   : > { %1135 = vmatprep.subr.bf16.mxu0 %v1134_v24  ;;  %1156 = vmatprep.subr.bf16.mxu1 %v1134_v24  ;;  %v377_v24 = vld [vmem:[#allocation2 + $0xe8] sm:$0xff] }
  0x98   : > { %1137 = vmatpush1.bf16.msra.mxu0 %v1136_v29  ;;  %1172 = vmatpush1.bf16.msra.mxu1 %v1136_v29  ;;  %v411_v29 = vld [vmem:[#allocation2 + $0x1f8] sm:$0xff] }
  0x99   : > { %1139 = vmatprep.subr.bf16.mxu0 %v1138_v30  ;;  %1157 = vmatprep.subr.bf16.mxu1 %v1138_v30  ;;  %v378_v30 = vld [vmem:[#allocation2 + $0xf0] sm:$0xff] }
  0x9c   : > { %1141 = vmatpush1.bf16.msra.mxu0 %v1140_v33  ;;  %1173 = vmatpush1.bf16.msra.mxu1 %v1140_v33  ;;  %v275_v33 = vshrl.u32 %v274_v32, 7 }
  0x9f   : > { %605 = vmatmul.mubr.f32.vlgmr.msra.gmra.mrb[0].mxu0 %v348_v34  ;;  %701 = vmatmul.mubr.f32.vlgmr.msra.gmra.mrb[0].mxu1 %v380_v35  ;;  %v276_v34 = vsub.s32 0, %v275_v33  ;;  %v272_v35 = vld [vmem:[%s264_s10] sm:$0x3] }
  0xa0   : > { %610 = vmatprep.mubr.f32.mxu0 %v351_v36  ;;  %706 = vmatprep.mubr.f32.mxu1 %v383_v37  ;;  %v280_v36 = vsub.s32 1, %v275_v33 }
  0xa1   : > { %v1662_v37 = vrot.slane %v272_v35, %v276_v34 }
  0xa3   : > { %611 = vmatmul.mubr.f32.gmra.mrb[2].mxu0 %v350_v38  ;;  %707 = vmatmul.mubr.f32.gmra.mrb[2].mxu1 %v382_v39  ;;  %v1664_v38 = vrot.slane %v272_v35, %v280_v36 }
  0xa4   : > { %616 = vmatprep.mubr.f32.mxu0 %v353_v40  ;;  %712 = vmatprep.mubr.f32.mxu1 %v385_v41 }
  0xa7   : > { %617 = vmatmul.mubr.f32.gmra.mrb[4].mxu0 %v352_v42  ;;  %713 = vmatmul.mubr.f32.gmra.mrb[4].mxu1 %v384_v43 }
  0xa8   : > { %622 = vmatprep.mubr.f32.mxu0 %v355_v44  ;;  %718 = vmatprep.mubr.f32.mxu1 %v387_v45 }
  0xab   : > { %623 = vmatmul.mubr.f32.gmra.mrb[6].mxu0 %v354_v46  ;;  %719 = vmatmul.mubr.f32.gmra.mrb[6].mxu1 %v386_v47 }
  0xac   : > { %628 = vmatprep.mubr.f32.mxu0 %v357_v48  ;;  %724 = vmatprep.mubr.f32.mxu1 %v389_v49 }
  0xaf   : > { %629 = vmatmul.mubr.f32.gmra.mrb[8].mxu0 %v356_v50  ;;  %725 = vmatmul.mubr.f32.gmra.mrb[8].mxu1 %v388_v51 }
  0xb0   : > { %634 = vmatprep.mubr.f32.mxu0 %v359_v52  ;;  %730 = vmatprep.mubr.f32.mxu1 %v391_v53 }
  0xb3   : > { %635 = vmatmul.mubr.f32.gmra.mrb[10].mxu0 %v358_v54  ;;  %731 = vmatmul.mubr.f32.gmra.mrb[10].mxu1 %v390_v55 }
  0xb4   : > { %640 = vmatprep.mubr.f32.mxu0 %v361_v56  ;;  %736 = vmatprep.mubr.f32.mxu1 %v393_v57 }
  0xb7   : > { %641 = vmatmul.mubr.f32.gmra.mrb[12].mxu0 %v360_v58  ;;  %737 = vmatmul.mubr.f32.gmra.mrb[12].mxu1 %v392_v59 }
  0xb8   : > { %646 = vmatprep.mubr.f32.mxu0 %v363_v60  ;;  %742 = vmatprep.mubr.f32.mxu1 %v395_v61 }
  0xbb   : > { %647 = vmatmul.mubr.f32.gmra.mrb[14].mxu0 %v362_v62  ;;  %743 = vmatmul.mubr.f32.gmra.mrb[14].mxu1 %v394_v63 }
  0xbc   : > { %652 = vmatprep.mubr.f32.mxu0 %v365_v0  ;;  %748 = vmatprep.mubr.f32.mxu1 %v397_v1 }
  0xbf   : > { %653 = vmatmul.mubr.f32.gmra.mrb[16].mxu0 %v364_v2  ;;  %749 = vmatmul.mubr.f32.gmra.mrb[16].mxu1 %v396_v3 }
  0xc0   : > { %658 = vmatprep.mubr.f32.mxu0 %v367_v4  ;;  %754 = vmatprep.mubr.f32.mxu1 %v399_v5 }
  0xc3   : > { %659 = vmatmul.mubr.f32.gmra.mrb[18].mxu0 %v366_v6  ;;  %755 = vmatmul.mubr.f32.gmra.mrb[18].mxu1 %v398_v7 }
  0xc4   : > { %664 = vmatprep.mubr.f32.mxu0 %v369_v8  ;;  %760 = vmatprep.mubr.f32.mxu1 %v401_v9 }
  0xc7   : > { %665 = vmatmul.mubr.f32.gmra.mrb[20].mxu0 %v368_v10  ;;  %761 = vmatmul.mubr.f32.gmra.mrb[20].mxu1 %v400_v11 }
  0xc8   : > { %670 = vmatprep.mubr.f32.mxu0 %v371_v12  ;;  %766 = vmatprep.mubr.f32.mxu1 %v403_v13 }
  0xcb   : > { %671 = vmatmul.mubr.f32.gmra.mrb[22].mxu0 %v370_v14  ;;  %767 = vmatmul.mubr.f32.gmra.mrb[22].mxu1 %v402_v15 }
  0xcc   : > { %676 = vmatprep.mubr.f32.mxu0 %v373_v16  ;;  %772 = vmatprep.mubr.f32.mxu1 %v405_v17 }
  0xcf   : > { %677 = vmatmul.mubr.f32.gmra.mrb[24].mxu0 %v372_v18  ;;  %773 = vmatmul.mubr.f32.gmra.mrb[24].mxu1 %v404_v19 }
  0xd0   : > { %682 = vmatprep.mubr.f32.mxu0 %v375_v20  ;;  %778 = vmatprep.mubr.f32.mxu1 %v407_v21 }
  0xd3   : > { %683 = vmatmul.mubr.f32.gmra.mrb[26].mxu0 %v374_v22  ;;  %779 = vmatmul.mubr.f32.gmra.mrb[26].mxu1 %v406_v23 }
  0xd4   : > { %688 = vmatprep.mubr.f32.mxu0 %v377_v24  ;;  %784 = vmatprep.mubr.f32.mxu1 %v409_v25 }
  0xd7   : > { %689 = vmatmul.mubr.f32.gmra.mrb[28].mxu0 %v376_v26  ;;  %785 = vmatmul.mubr.f32.gmra.mrb[28].mxu1 %v408_v27 }
  0xd8   : > { %694 = vmatprep.mubr.f32.mxu0 %v379_v28  ;;  %790 = vmatprep.mubr.f32.mxu1 %v411_v29 }
  0xdb   : > { %695 = vmatmul.mubr.f32.gmra.mrb[30].mxu0 %v378_v30  ;;  %791 = vmatmul.mubr.f32.gmra.mrb[30].mxu1 %v410_v31 }
 0x172   : > { %v606_v39 = vpop.f32.mrb[0].mxu0  ;;  %v702_v40 = vpop.f32.mrb[0].mxu1 }
 0x173   : > { %v797_v41 = vadd.f32 %v606_v39, %v1662_v37  ;;  %v829_v42 = vadd.f32 %v702_v40, %v1662_v37  ;;  %v608_v43 = vpop.f32.mrb[1].mxu0  ;;  %v704_v44 = vpop.f32.mrb[1].mxu1 }
 0x174   : > { %v798_v45 = vadd.f32 %v608_v43, %v1664_v38  ;;  %v830_v46 = vadd.f32 %v704_v44, %v1664_v38 }
 0x175   : > { %861 = vst [vmem:[%s1672_s11] sm:$0xff] %v797_v41  ;;  %893 = vst [vmem:[%s1672_s11 + $0x100] sm:$0xff] %v829_v42 }
 0x176   : > { %862 = vst [vmem:[%s1672_s11 + $0x8] sm:$0xff] %v798_v45  ;;  %894 = vst [vmem:[%s1672_s11 + $0x108] sm:$0xff] %v830_v46  ;;  %v612_v47 = vpop.f32.mrb[2].mxu0  ;;  %v708_v48 = vpop.f32.mrb[2].mxu1 }
 0x177   : > { %v799_v49 = vadd.f32 %v612_v47, %v1662_v37  ;;  %v831_v50 = vadd.f32 %v708_v48, %v1662_v37  ;;  %v614_v51 = vpop.f32.mrb[3].mxu0  ;;  %v710_v52 = vpop.f32.mrb[3].mxu1 }
 0x178   : > { %v800_v53 = vadd.f32 %v614_v51, %v1664_v38  ;;  %v832_v54 = vadd.f32 %v710_v52, %v1664_v38 }
 0x179   : > { %863 = vst [vmem:[%s1672_s11 + $0x10] sm:$0xff] %v799_v49  ;;  %895 = vst [vmem:[%s1672_s11 + $0x110] sm:$0xff] %v831_v50 }
 0x17a   : > { %864 = vst [vmem:[%s1672_s11 + $0x18] sm:$0xff] %v800_v53  ;;  %896 = vst [vmem:[%s1672_s11 + $0x118] sm:$0xff] %v832_v54  ;;  %v618_v55 = vpop.f32.mrb[4].mxu0  ;;  %v714_v56 = vpop.f32.mrb[4].mxu1 }
 0x17b   : > { %v801_v57 = vadd.f32 %v618_v55, %v1662_v37  ;;  %v833_v58 = vadd.f32 %v714_v56, %v1662_v37  ;;  %v620_v59 = vpop.f32.mrb[5].mxu0  ;;  %v716_v60 = vpop.f32.mrb[5].mxu1 }
 0x17c   : > { %v802_v61 = vadd.f32 %v620_v59, %v1664_v38  ;;  %v834_v62 = vadd.f32 %v716_v60, %v1664_v38 }
 0x17d   : > { %865 = vst [vmem:[%s1672_s11 + $0x20] sm:$0xff] %v801_v57  ;;  %897 = vst [vmem:[%s1672_s11 + $0x120] sm:$0xff] %v833_v58 }
 0x17e   : > { %866 = vst [vmem:[%s1672_s11 + $0x28] sm:$0xff] %v802_v61  ;;  %898 = vst [vmem:[%s1672_s11 + $0x128] sm:$0xff] %v834_v62  ;;  %v624_v63 = vpop.f32.mrb[6].mxu0  ;;  %v720_v0 = vpop.f32.mrb[6].mxu1 }
 0x17f   : > { %v803_v1 = vadd.f32 %v624_v63, %v1662_v37  ;;  %v835_v2 = vadd.f32 %v720_v0, %v1662_v37  ;;  %v626_v3 = vpop.f32.mrb[7].mxu0  ;;  %v722_v4 = vpop.f32.mrb[7].mxu1 }
 0x180   : > { %v804_v5 = vadd.f32 %v626_v3, %v1664_v38  ;;  %v836_v6 = vadd.f32 %v722_v4, %v1664_v38 }
 0x181   : > { %867 = vst [vmem:[%s1672_s11 + $0x30] sm:$0xff] %v803_v1  ;;  %899 = vst [vmem:[%s1672_s11 + $0x130] sm:$0xff] %v835_v2 }
 0x182   : > { %868 = vst [vmem:[%s1672_s11 + $0x38] sm:$0xff] %v804_v5  ;;  %900 = vst [vmem:[%s1672_s11 + $0x138] sm:$0xff] %v836_v6  ;;  %v630_v7 = vpop.f32.mrb[8].mxu0  ;;  %v726_v8 = vpop.f32.mrb[8].mxu1 }
 0x183   : > { %v805_v9 = vadd.f32 %v630_v7, %v1662_v37  ;;  %v837_v10 = vadd.f32 %v726_v8, %v1662_v37  ;;  %v632_v11 = vpop.f32.mrb[9].mxu0  ;;  %v728_v12 = vpop.f32.mrb[9].mxu1 }
 0x184   : > { %v806_v13 = vadd.f32 %v632_v11, %v1664_v38  ;;  %v838_v14 = vadd.f32 %v728_v12, %v1664_v38 }
 0x185   : > { %869 = vst [vmem:[%s1672_s11 + $0x40] sm:$0xff] %v805_v9  ;;  %901 = vst [vmem:[%s1672_s11 + $0x140] sm:$0xff] %v837_v10 }
 0x186   : > { %870 = vst [vmem:[%s1672_s11 + $0x48] sm:$0xff] %v806_v13  ;;  %902 = vst [vmem:[%s1672_s11 + $0x148] sm:$0xff] %v838_v14  ;;  %v636_v15 = vpop.f32.mrb[10].mxu0  ;;  %v732_v16 = vpop.f32.mrb[10].mxu1 }
 0x187   : > { %v807_v17 = vadd.f32 %v636_v15, %v1662_v37  ;;  %v839_v18 = vadd.f32 %v732_v16, %v1662_v37  ;;  %v638_v19 = vpop.f32.mrb[11].mxu0  ;;  %v734_v20 = vpop.f32.mrb[11].mxu1 }
 0x188   : > { %v808_v21 = vadd.f32 %v638_v19, %v1664_v38  ;;  %v840_v22 = vadd.f32 %v734_v20, %v1664_v38 }
 0x189   : > { %871 = vst [vmem:[%s1672_s11 + $0x50] sm:$0xff] %v807_v17  ;;  %903 = vst [vmem:[%s1672_s11 + $0x150] sm:$0xff] %v839_v18 }
 0x18a   : > { %872 = vst [vmem:[%s1672_s11 + $0x58] sm:$0xff] %v808_v21  ;;  %904 = vst [vmem:[%s1672_s11 + $0x158] sm:$0xff] %v840_v22  ;;  %v642_v23 = vpop.f32.mrb[12].mxu0  ;;  %v738_v24 = vpop.f32.mrb[12].mxu1 }
 0x18b   : > { %v809_v25 = vadd.f32 %v642_v23, %v1662_v37  ;;  %v841_v26 = vadd.f32 %v738_v24, %v1662_v37  ;;  %v644_v27 = vpop.f32.mrb[13].mxu0  ;;  %v740_v28 = vpop.f32.mrb[13].mxu1 }
 0x18c   : > { %v810_v29 = vadd.f32 %v644_v27, %v1664_v38  ;;  %v842_v30 = vadd.f32 %v740_v28, %v1664_v38 }
 0x18d   : > { %873 = vst [vmem:[%s1672_s11 + $0x60] sm:$0xff] %v809_v25  ;;  %905 = vst [vmem:[%s1672_s11 + $0x160] sm:$0xff] %v841_v26 }
 0x18e   : > { %874 = vst [vmem:[%s1672_s11 + $0x68] sm:$0xff] %v810_v29  ;;  %906 = vst [vmem:[%s1672_s11 + $0x168] sm:$0xff] %v842_v30  ;;  %v648_v31 = vpop.f32.mrb[14].mxu0  ;;  %v744_v32 = vpop.f32.mrb[14].mxu1 }
 0x18f   : > { %v811_v33 = vadd.f32 %v648_v31, %v1662_v37  ;;  %v843_v34 = vadd.f32 %v744_v32, %v1662_v37  ;;  %v650_v35 = vpop.f32.mrb[15].mxu0  ;;  %v746_v36 = vpop.f32.mrb[15].mxu1 }
 0x190   : > { %v812_v39 = vadd.f32 %v650_v35, %v1664_v38  ;;  %v844_v40 = vadd.f32 %v746_v36, %v1664_v38 }
 0x191   : > { %875 = vst [vmem:[%s1672_s11 + $0x70] sm:$0xff] %v811_v33  ;;  %907 = vst [vmem:[%s1672_s11 + $0x170] sm:$0xff] %v843_v34 }
 0x192   : > { %876 = vst [vmem:[%s1672_s11 + $0x78] sm:$0xff] %v812_v39  ;;  %908 = vst [vmem:[%s1672_s11 + $0x178] sm:$0xff] %v844_v40  ;;  %v654_v41 = vpop.f32.mrb[16].mxu0  ;;  %v750_v42 = vpop.f32.mrb[16].mxu1 }
 0x193   : > { %v813_v43 = vadd.f32 %v654_v41, %v1662_v37  ;;  %v845_v44 = vadd.f32 %v750_v42, %v1662_v37  ;;  %v656_v45 = vpop.f32.mrb[17].mxu0  ;;  %v752_v46 = vpop.f32.mrb[17].mxu1 }
 0x194   : > { %v814_v47 = vadd.f32 %v656_v45, %v1664_v38  ;;  %v846_v48 = vadd.f32 %v752_v46, %v1664_v38 }
 0x195   : > { %877 = vst [vmem:[%s1672_s11 + $0x80] sm:$0xff] %v813_v43  ;;  %909 = vst [vmem:[%s1672_s11 + $0x180] sm:$0xff] %v845_v44 }
 0x196   : > { %878 = vst [vmem:[%s1672_s11 + $0x88] sm:$0xff] %v814_v47  ;;  %910 = vst [vmem:[%s1672_s11 + $0x188] sm:$0xff] %v846_v48  ;;  %v660_v49 = vpop.f32.mrb[18].mxu0  ;;  %v756_v50 = vpop.f32.mrb[18].mxu1 }
 0x197   : > { %v815_v51 = vadd.f32 %v660_v49, %v1662_v37  ;;  %v847_v52 = vadd.f32 %v756_v50, %v1662_v37  ;;  %v662_v53 = vpop.f32.mrb[19].mxu0  ;;  %v758_v54 = vpop.f32.mrb[19].mxu1 }
 0x198   : > { %v816_v55 = vadd.f32 %v662_v53, %v1664_v38  ;;  %v848_v56 = vadd.f32 %v758_v54, %v1664_v38 }
 0x199   : > { %879 = vst [vmem:[%s1672_s11 + $0x90] sm:$0xff] %v815_v51  ;;  %911 = vst [vmem:[%s1672_s11 + $0x190] sm:$0xff] %v847_v52 }
 0x19a   : > { %880 = vst [vmem:[%s1672_s11 + $0x98] sm:$0xff] %v816_v55  ;;  %912 = vst [vmem:[%s1672_s11 + $0x198] sm:$0xff] %v848_v56  ;;  %v666_v57 = vpop.f32.mrb[20].mxu0  ;;  %v762_v58 = vpop.f32.mrb[20].mxu1 }
 0x19b   : > { %v817_v59 = vadd.f32 %v666_v57, %v1662_v37  ;;  %v849_v60 = vadd.f32 %v762_v58, %v1662_v37  ;;  %v668_v61 = vpop.f32.mrb[21].mxu0  ;;  %v764_v62 = vpop.f32.mrb[21].mxu1 }
 0x19c   : > { %v818_v63 = vadd.f32 %v668_v61, %v1664_v38  ;;  %v850_v0 = vadd.f32 %v764_v62, %v1664_v38 }
 0x19d   : > { %881 = vst [vmem:[%s1672_s11 + $0xa0] sm:$0xff] %v817_v59  ;;  %913 = vst [vmem:[%s1672_s11 + $0x1a0] sm:$0xff] %v849_v60 }
 0x19e   : > { %882 = vst [vmem:[%s1672_s11 + $0xa8] sm:$0xff] %v818_v63  ;;  %914 = vst [vmem:[%s1672_s11 + $0x1a8] sm:$0xff] %v850_v0  ;;  %v672_v1 = vpop.f32.mrb[22].mxu0  ;;  %v768_v2 = vpop.f32.mrb[22].mxu1 }
 0x19f   : > { %v819_v3 = vadd.f32 %v672_v1, %v1662_v37  ;;  %v851_v4 = vadd.f32 %v768_v2, %v1662_v37  ;;  %v674_v5 = vpop.f32.mrb[23].mxu0  ;;  %v770_v6 = vpop.f32.mrb[23].mxu1 }
 0x1a0   : > { %v820_v7 = vadd.f32 %v674_v5, %v1664_v38  ;;  %v852_v8 = vadd.f32 %v770_v6, %v1664_v38 }
 0x1a1   : > { %883 = vst [vmem:[%s1672_s11 + $0xb0] sm:$0xff] %v819_v3  ;;  %915 = vst [vmem:[%s1672_s11 + $0x1b0] sm:$0xff] %v851_v4 }
 0x1a2   : > { %884 = vst [vmem:[%s1672_s11 + $0xb8] sm:$0xff] %v820_v7  ;;  %916 = vst [vmem:[%s1672_s11 + $0x1b8] sm:$0xff] %v852_v8  ;;  %v678_v9 = vpop.f32.mrb[24].mxu0  ;;  %v774_v10 = vpop.f32.mrb[24].mxu1 }
 0x1a3   : > { %v821_v11 = vadd.f32 %v678_v9, %v1662_v37  ;;  %v853_v12 = vadd.f32 %v774_v10, %v1662_v37  ;;  %v680_v13 = vpop.f32.mrb[25].mxu0  ;;  %v776_v14 = vpop.f32.mrb[25].mxu1 }
 0x1a4   : > { %v822_v15 = vadd.f32 %v680_v13, %v1664_v38  ;;  %v854_v16 = vadd.f32 %v776_v14, %v1664_v38 }
 0x1a5   : > { %885 = vst [vmem:[%s1672_s11 + $0xc0] sm:$0xff] %v821_v11  ;;  %917 = vst [vmem:[%s1672_s11 + $0x1c0] sm:$0xff] %v853_v12 }
 0x1a6   : > { %886 = vst [vmem:[%s1672_s11 + $0xc8] sm:$0xff] %v822_v15  ;;  %918 = vst [vmem:[%s1672_s11 + $0x1c8] sm:$0xff] %v854_v16  ;;  %v684_v17 = vpop.f32.mrb[26].mxu0  ;;  %v780_v18 = vpop.f32.mrb[26].mxu1 }
 0x1a7   : > { %v823_v19 = vadd.f32 %v684_v17, %v1662_v37  ;;  %v855_v20 = vadd.f32 %v780_v18, %v1662_v37  ;;  %v686_v21 = vpop.f32.mrb[27].mxu0  ;;  %v782_v22 = vpop.f32.mrb[27].mxu1 }
 0x1a8   : > { %v824_v23 = vadd.f32 %v686_v21, %v1664_v38  ;;  %v856_v24 = vadd.f32 %v782_v22, %v1664_v38 }
 0x1a9   : > { %887 = vst [vmem:[%s1672_s11 + $0xd0] sm:$0xff] %v823_v19  ;;  %919 = vst [vmem:[%s1672_s11 + $0x1d0] sm:$0xff] %v855_v20 }
 0x1aa   : > { %888 = vst [vmem:[%s1672_s11 + $0xd8] sm:$0xff] %v824_v23  ;;  %920 = vst [vmem:[%s1672_s11 + $0x1d8] sm:$0xff] %v856_v24  ;;  %v690_v25 = vpop.f32.mrb[28].mxu0  ;;  %v786_v26 = vpop.f32.mrb[28].mxu1 }
 0x1ab   : > { %v825_v27 = vadd.f32 %v690_v25, %v1662_v37  ;;  %v857_v28 = vadd.f32 %v786_v26, %v1662_v37  ;;  %v692_v29 = vpop.f32.mrb[29].mxu0  ;;  %v788_v30 = vpop.f32.mrb[29].mxu1 }
 0x1ac   : > { %v826_v31 = vadd.f32 %v692_v29, %v1664_v38  ;;  %v858_v32 = vadd.f32 %v788_v30, %v1664_v38 }
 0x1ad   : > { %889 = vst [vmem:[%s1672_s11 + $0xe0] sm:$0xff] %v825_v27  ;;  %921 = vst [vmem:[%s1672_s11 + $0x1e0] sm:$0xff] %v857_v28 }
 0x1ae   : > { %890 = vst [vmem:[%s1672_s11 + $0xe8] sm:$0xff] %v826_v31  ;;  %922 = vst [vmem:[%s1672_s11 + $0x1e8] sm:$0xff] %v858_v32  ;;  %v696_v33 = vpop.f32.mrb[30].mxu0  ;;  %v792_v34 = vpop.f32.mrb[30].mxu1 }
 0x1af   : > { %v827_v35 = vadd.f32 %v696_v33, %v1662_v37  ;;  %v859_v36 = vadd.f32 %v792_v34, %v1662_v37  ;;  %v698_v39 = vpop.f32.mrb[31].mxu0  ;;  %v794_v40 = vpop.f32.mrb[31].mxu1 }
 0x1b0   : > { %v828_v41 = vadd.f32 %v698_v39, %v1664_v38  ;;  %v860_v42 = vadd.f32 %v794_v40, %v1664_v38 }
 0x1b1   : > { %891 = vst [vmem:[%s1672_s11 + $0xf0] sm:$0xff] %v827_v35  ;;  %923 = vst [vmem:[%s1672_s11 + $0x1f0] sm:$0xff] %v859_v36 }
 0x1b2   : > { %892 = vst [vmem:[%s1672_s11 + $0xf8] sm:$0xff] %v828_v41  ;;  %924 = vst [vmem:[%s1672_s11 + $0x1f8] sm:$0xff] %v860_v42 }
 0x1b3   : > { %1324 = shalt.err (!%p1321_p1)
}
 0x1b4   : > { %s1325_s6 = scalar_lea.hbm %s1795_s15, 8192  ;;  %s1329_s22 = scalar_lea.hbm %s1856_s3, 24576 }
 0x1b5   : > { %p1326_p5 = scmp.ne.s32.totalorder %s1795_s15, %s1325_s6  ;;  %p1330_p2 = scmp.lt.u32.totalorder %s1795_s15, %s1856_s3 }
 0x1b6   : > { %p1331_p8 = scmp.lt.u32.totalorder %s1329_s22, %s1325_s6  ;;  %p1333_p11 = scmp.lt.u32.totalorder %s1325_s6, %s1795_s15 }
 0x1b7   : > { %p1327_p7 = pnand %p1326_p5, %p1877_p4 }
 0x1b8   : > { %p1332_p9 = por %p1331_p8, %p1330_p2 }
 0x1b9   : > { %p1328_p12 = pneg %p1327_p7 }
 0x1ba   : > { %p1334_p13 = por %p1333_p11, %p1332_p9 }
 0x1bc   : > { %p1335_p0 = pnand %p1334_p13, %p1328_p12 }
 0x1be   : > { %1338 = shalt.err (!%p1335_p0)
}
 0x1bf   : > { %s1405_s11 = smov 256   ;;  %s1406_s26 = smov 768  }
 0x1c0   : > { %s1407_s4 = smov 16  }
 0x1c1   : > { %1180 = dma.vmem_to_hbm [thread:$0]  (%p1877_p4), %s1799_s9, 8192, %s1795_s15, %s926_s27, %s1405_s11, %s1406_s26, %s1407_s4  }
 0x1c2 PF: > { %p1197_p10 = scmp.ge.s32.totalorder %s1397_s17, 2  ;;  %s957_s5 = sand.u32 1, %s1377_s12  }
 0x1c3   : > { %p1878_p3 = scmp.ne.s32.totalorder %s1868_s24, 0  ;;  %s958_s7 = scalar_lea.sflag [#allocation4], %s957_s5 }
 0x1c5   : > { %p1191_p6 = pnand %p1197_p10, %p1878_p3 }
 0x1c7   : > { %1372 = dma.done.wait (!%p1191_p6), %s958_s7, 8192  }
 0x1c8   : > { %1374 = vsyncadd (!%p1191_p6), %s958_s7, 4294959104  ;;  %s20_s17 = sadd.s32 1, %s1397_s17   ;;  %s1879_s12 = smov %s1381_s13 }
 0x1c9   : > { %p17_p1 = scmp.ge.s32.totalorder %s20_s17, 5   ;;  %s1880_s13 = smov %s1385_s14 }
 0x1ca   : > { %s1881_s14 = smov %s1541_s21  ;;  %s1882_s15 = smov %s1393_s16 }
 0x1cb   : > { %s1883_s16 = smov %s1885_s30  ;;  %19 = sbr.rel (!%p17_p1) target bundleno = 7 (0x7), region = 90 }
 0x1d2   :  { %963 = vsyncpa [#allocation3], 1 }
 0x1d3   :  { %965 = vsyncpa [#allocation3 + $0x1], 1 }
 0x1d4   :  { %966 = vsyncpa [#allocation6], 1 }
 0x1d5   :  { %968 = vsyncpa [#allocation6 + $0x1], 1 }
 0x1d6   :  { %969 = vsyncpa [#allocation4], 1 }
 0x1d7   :  { %971 = vsyncpa [#allocation4 + $0x1], 1 }

</bundles_post_ra>
